<compile_context>
chip_gen: v5e
topology: v5e:2x2
jax: 0.10.0
libtpu: 0.0.40
codegen_flags: <defaults>
</compile_context>

<pallas_src>
import jax
import jax.numpy as jnp
import numpy as np
from jax import lax
from jax.experimental import pallas as pl
from jax.experimental.pallas import tpu as pltpu


def _round_up(x, m):
    return ((x + m - 1) // m) * m


def _cdiv(a, b):
    return (a + b - 1) // b


def qnet_kernel(x_ref, wsa_ref, bsa_ref, wq_ref, bq_ref, wot_ref, bo_ref,
                out_ref):
    # Fused fc_s/fc_a: h = relu([s|a] @ blockdiag(Ws, Wa) + [bs|ba])  (TB, 128)
    h = jnp.dot(x_ref[...], wsa_ref[...], preferred_element_type=jnp.float32)
    h = jnp.maximum(h + bsa_ref[...], 0.0)

    # fc_q: q = relu(h @ Wq + bq)                                      (TB, 32)
    q = jnp.dot(h, wq_ref[...], preferred_element_type=jnp.float32)
    q = jnp.maximum(q + bq_ref[...], 0.0)

    # fc_out, lane-dense: out_row[0, b] = sum_k Wo^T[0, k] * q[b, k]   (1, TB)
    out_row = lax.dot_general(
        wot_ref[...], q,
        dimension_numbers=(((1,), (1,)), ((), ())),
        preferred_element_type=jnp.float32)
    out_ref[...] = out_row + bo_ref[...]            # bo (1,1) broadcasts over lanes


def qnet_forward(s, a, params, *, tile_b=512):
    """s: (B, 3) f32, a: (B, 1) f32 -> (B, 1) f32."""
    B = s.shape[0]
    ws, bs, wa, ba, wq, bq, wo, bo = params

    # ---- parameter prep (tiny, plain JAX) ---------------------------------
    # Block-diagonal fused first-layer weight (4, 128) and bias (1, 128).
    w_sa = jnp.zeros((4, 128), jnp.float32)
    w_sa = w_sa.at[:3, :64].set(ws)
    w_sa = w_sa.at[3:, 64:].set(wa)
    b_sa = jnp.concatenate([bs, ba], axis=1)          # (1, 128)
    wo_t = wo.T                                       # (1, 32)

    x = jnp.concatenate([s, a], axis=1)               # (B, 4) streamed input

    # ---- batch tiling / padding -------------------------------------------
    tb = min(tile_b, _round_up(B, 8))                 # don't pad tiny batches up
    tb = _round_up(tb, 8)
    if B >= 16 and _cdiv(B, tb) < 2:                  # keep >=2 steps (v7x: 2 TCs)
        tb = _round_up(_cdiv(B, 2), 8)
    padded_B = _round_up(B, tb)
    if padded_B != B:
        x = jnp.pad(x, ((0, padded_B - B), (0, 0)))
    nb = padded_B // tb

    const = lambda i: (0, 0)                          # resident parameters

    out3d = pl.pallas_call(
        qnet_kernel,
        out_shape=jax.ShapeDtypeStruct((nb, 1, tb), jnp.float32),
        grid_spec=pltpu.PrefetchScalarGridSpec(
            num_scalar_prefetch=0,
            grid=(nb,),
            in_specs=[
                pl.BlockSpec((tb, 4), lambda i: (i, 0)),   # [s|a] tile (streamed)
                pl.BlockSpec((4, 128), const),             # fused W_sa
                pl.BlockSpec((1, 128), const),             # fused b_sa
                pl.BlockSpec((128, 32), const),            # Wq
                pl.BlockSpec((1, 32), const),              # bq
                pl.BlockSpec((1, 32), const),              # Wo^T
                pl.BlockSpec((1, 1), const),               # bo
            ],
            # Lane-dense output slab: block == full (1, tb) on the last two dims.
            out_specs=pl.BlockSpec((None, 1, tb), lambda i: (i, 0, 0)),
        ),
        compiler_params=pltpu.CompilerParams(
            dimension_semantics=("parallel",)),
    )(x, w_sa, b_sa, wq, bq, wo_t, bo)

    return out3d.reshape(padded_B, 1)[:B]


def init_params(key):
    """Deterministic synthetic parameters with PyTorch Linear shapes
    (stored transposed as (in, out))."""
    ks = jax.random.split(key, 8)

    def lin(kw, kb, fan_in, fan_out):
        bound = 1.0 / np.sqrt(fan_in)
        w = jax.random.uniform(kw, (fan_in, fan_out), jnp.float32, -bound, bound)
        b = jax.random.uniform(kb, (1, fan_out), jnp.float32, -bound, bound)
        return w, b

    ws, bs = lin(ks[0], ks[1], 3, 64)     # fc_s
    wa, ba = lin(ks[2], ks[3], 1, 64)     # fc_a
    wq, bq = lin(ks[4], ks[5], 128, 32)   # fc_q
    wo, bo = lin(ks[6], ks[7], 32, 1)     # fc_out
    return (ws, bs, wa, ba, wq, bq, wo, bo)


def qnet_reference(s, a, params):
    ws, bs, wa, ba, wq, bq, wo, bo = params
    h1 = jax.nn.relu(s @ ws + bs)
    h2 = jax.nn.relu(a @ wa + ba)
    cat = jnp.concatenate([h1, h2], axis=1)
    q = jax.nn.relu(cat @ wq + bq)
    return q @ wo + bo


if __name__ == "__main__":
    key = jax.random.PRNGKey(0)
    kp, ks_, ka_ = jax.random.split(key, 3)
    params = init_params(kp)

    # Two configurations: a non-multiple batch exercising padding + a 2-step
    # grid with lane-dense 128-wide output stores, and a tiny batch.
    for B, tb in [(200, 128), (8, 512)]:
        s = jax.random.normal(ks_, (B, 3), jnp.float32)
        a = jax.random.normal(ka_, (B, 1), jnp.float32)

        out = jax.block_until_ready(qnet_forward(s, a, params, tile_b=tb))
        ref = qnet_reference(s, a, params)
        np.testing.assert_allclose(np.asarray(out), np.asarray(ref),
                                   rtol=1e-5, atol=1e-5)

    print("KERNEL_OK")
</pallas_src>

<mosaic_0001>
module attributes {stable_mosaic.version = 11 : i64} {
  func.func @qnet_kernel(%arg0: i32, %arg1: memref<128x4xf32, #tpu.memory_space<vmem>>, %arg2: memref<4x128xf32, #tpu.memory_space<vmem>>, %arg3: memref<1x128xf32, #tpu.memory_space<vmem>>, %arg4: memref<128x32xf32, #tpu.memory_space<vmem>>, %arg5: memref<1x32xf32, #tpu.memory_space<vmem>>, %arg6: memref<1x32xf32, #tpu.memory_space<vmem>>, %arg7: memref<1x1xf32, #tpu.memory_space<vmem>>, %arg8: memref<1x1x128xf32, #tpu.memory_space<vmem>>) attributes {dimension_semantics = [#tpu.dimension_semantics<parallel>], iteration_bounds = array<i64: 2>, scalar_prefetch = 0 : i64, scratch_operands = 0 : i64, tpu.core_type = #tpu.core_type<tc>, window_params = [{transform_indices = @transform_0, window_bounds = array<i64: 128, 4>}, {pipeline_mode = #tpu.pipeline_mode<synchronous>, transform_indices = @transform_1, window_bounds = array<i64: 4, 128>}, {pipeline_mode = #tpu.pipeline_mode<synchronous>, transform_indices = @transform_2, window_bounds = array<i64: 1, 128>}, {pipeline_mode = #tpu.pipeline_mode<synchronous>, transform_indices = @transform_3, window_bounds = array<i64: 128, 32>}, {pipeline_mode = #tpu.pipeline_mode<synchronous>, transform_indices = @transform_4, window_bounds = array<i64: 1, 32>}, {pipeline_mode = #tpu.pipeline_mode<synchronous>, transform_indices = @transform_5, window_bounds = array<i64: 1, 32>}, {pipeline_mode = #tpu.pipeline_mode<synchronous>, transform_indices = @transform_6, window_bounds = array<i64: 1, 1>}, {transform_indices = @transform_7, window_bounds = array<i64: 1, 1, 128>}]} {
    %c0 = arith.constant 0 : index
    %c0_0 = arith.constant 0 : index
    %0 = vector.load %arg1[%c0, %c0_0] : memref<128x4xf32, #tpu.memory_space<vmem>>, vector<128x4xf32>
    %c0_1 = arith.constant 0 : index
    %c0_2 = arith.constant 0 : index
    %1 = vector.load %arg2[%c0_1, %c0_2] : memref<4x128xf32, #tpu.memory_space<vmem>>, vector<4x128xf32>
    %cst = arith.constant dense<0.000000e+00> : vector<128x128xf32>
    %2 = tpu.matmul %0, %1, %cst {dimension_numbers = #tpu.dot_dimension_numbers<[1], [0], [0], [1], [0, 0, 1, 1], [], []>} : vector<128x4xf32>, vector<4x128xf32>, vector<128x128xf32> -> vector<128x128xf32>
    %c0_3 = arith.constant 0 : index
    %c0_4 = arith.constant 0 : index
    %3 = vector.load %arg3[%c0_3, %c0_4] : memref<1x128xf32, #tpu.memory_space<vmem>>, vector<1x128xf32>
    %4 = vector.broadcast %3 : vector<1x128xf32> to vector<128x128xf32>
    %5 = arith.addf %2, %4 : vector<128x128xf32>
    %cst_5 = arith.constant 0.000000e+00 : f32
    %6 = vector.broadcast %cst_5 : f32 to vector<128x128xf32>
    %7 = arith.maximumf %5, %6 : vector<128x128xf32>
    %c0_6 = arith.constant 0 : index
    %c0_7 = arith.constant 0 : index
    %8 = vector.load %arg4[%c0_6, %c0_7] : memref<128x32xf32, #tpu.memory_space<vmem>>, vector<128x32xf32>
    %cst_8 = arith.constant dense<0.000000e+00> : vector<128x32xf32>
    %9 = tpu.matmul %7, %8, %cst_8 {dimension_numbers = #tpu.dot_dimension_numbers<[1], [0], [0], [1], [0, 0, 1, 1], [], []>} : vector<128x128xf32>, vector<128x32xf32>, vector<128x32xf32> -> vector<128x32xf32>
    %c0_9 = arith.constant 0 : index
    %c0_10 = arith.constant 0 : index
    %10 = vector.load %arg5[%c0_9, %c0_10] : memref<1x32xf32, #tpu.memory_space<vmem>>, vector<1x32xf32>
    %11 = vector.broadcast %10 : vector<1x32xf32> to vector<128x32xf32>
    %12 = arith.addf %9, %11 : vector<128x32xf32>
    %cst_11 = arith.constant 0.000000e+00 : f32
    %13 = vector.broadcast %cst_11 : f32 to vector<128x32xf32>
    %14 = arith.maximumf %12, %13 : vector<128x32xf32>
    %c0_12 = arith.constant 0 : index
    %c0_13 = arith.constant 0 : index
    %15 = vector.load %arg6[%c0_12, %c0_13] : memref<1x32xf32, #tpu.memory_space<vmem>>, vector<1x32xf32>
    %cst_14 = arith.constant dense<0.000000e+00> : vector<1x128xf32>
    %16 = tpu.matmul %15, %14, %cst_14 {dimension_numbers = #tpu.dot_dimension_numbers<[1], [1], [0], [0], [0, 0, 1, 0], [], []>} : vector<1x32xf32>, vector<128x32xf32>, vector<1x128xf32> -> vector<1x128xf32>
    %c0_15 = arith.constant 0 : index
    %c0_16 = arith.constant 0 : index
    %17 = vector.load %arg7[%c0_15, %c0_16] : memref<1x1xf32, #tpu.memory_space<vmem>>, vector<1x1xf32>
    %18 = vector.broadcast %17 : vector<1x1xf32> to vector<1x128xf32>
    %19 = arith.addf %16, %18 : vector<1x128xf32>
    %c0_17 = arith.constant 0 : index
    %c0_18 = arith.constant 0 : index
    %c0_19 = arith.constant 0 : index
    %20 = vector.load %arg8[%c0_17, %c0_18, %c0_19] : memref<1x1x128xf32, #tpu.memory_space<vmem>>, vector<1x1x128xf32>
    %21 = vector.shape_cast %20 : vector<1x1x128xf32> to vector<1x128xf32>
    %22 = vector.shape_cast %19 : vector<1x128xf32> to vector<1x1x128xf32>
    tpu.vector_store %arg8[%c0_17, %c0_18, %c0_19], %22 {strides = array<i32>} : memref<1x1x128xf32, #tpu.memory_space<vmem>>, vector<1x1x128xf32>,
    return
  }
  func.func @transform_0(%arg0: i32) -> (i32, i32) {
    %c0_i32 = arith.constant 0 : i32
    %c0_i32_0 = arith.constant 0 : i32
    return %arg0, %c0_i32 : i32, i32
  }
  func.func @transform_1(%arg0: i32) -> (i32, i32) {
    %c0_i32 = arith.constant 0 : i32
    %c0_i32_0 = arith.constant 0 : i32
    %c0_i32_1 = arith.constant 0 : i32
    return %c0_i32, %c0_i32_0 : i32, i32
  }
  func.func @transform_2(%arg0: i32) -> (i32, i32) {
    %c0_i32 = arith.constant 0 : i32
    %c0_i32_0 = arith.constant 0 : i32
    %c0_i32_1 = arith.constant 0 : i32
    return %c0_i32, %c0_i32_0 : i32, i32
  }
  func.func @transform_3(%arg0: i32) -> (i32, i32) {
    %c0_i32 = arith.constant 0 : i32
    %c0_i32_0 = arith.constant 0 : i32
    %c0_i32_1 = arith.constant 0 : i32
    return %c0_i32, %c0_i32_0 : i32, i32
  }
  func.func @transform_4(%arg0: i32) -> (i32, i32) {
    %c0_i32 = arith.constant 0 : i32
    %c0_i32_0 = arith.constant 0 : i32
    %c0_i32_1 = arith.constant 0 : i32
    return %c0_i32, %c0_i32_0 : i32, i32
  }
  func.func @transform_5(%arg0: i32) -> (i32, i32) {
    %c0_i32 = arith.constant 0 : i32
    %c0_i32_0 = arith.constant 0 : i32
    %c0_i32_1 = arith.constant 0 : i32
    return %c0_i32, %c0_i32_0 : i32, i32
  }
  func.func @transform_6(%arg0: i32) -> (i32, i32) {
    %c0_i32 = arith.constant 0 : i32
    %c0_i32_0 = arith.constant 0 : i32
    %c0_i32_1 = arith.constant 0 : i32
    return %c0_i32, %c0_i32_0 : i32, i32
  }
  func.func @transform_7(%arg0: i32) -> (i32, i32, i32) {
    %c0_i32 = arith.constant 0 : i32
    %c0_i32_0 = arith.constant 0 : i32
    %c0_i32_1 = arith.constant 0 : i32
    return %arg0, %c0_i32, %c0_i32_0 : i32, i32, i32
  }
}

</mosaic_0001>

<bundles_post_ra>
// kernel: tpu_custom_call.1
= control target key start
LH: loop header
LB: loop body
LE: loop exit
PB: predicated region body
PF: predicated region fallthrough
CT: control target
= control target key end

     0   :  { %s1092_s0 = inlined_call_operand.vmem [shape: f32[256,4], index: 0, kind: input, shape index: {}]   ;;  %s1093_s1 = inlined_call_operand.vmem [shape: f32[4,128], index: 1, kind: input, shape index: {}]   ;;  %s1094_s2 = inlined_call_operand.vmem [shape: f32[1,128], index: 2, kind: input, shape index: {}]   ;;  %s1095_s3 = inlined_call_operand.vmem [shape: f32[128,32], index: 3, kind: input, shape index: {}]   ;;  %s1096_s4 = inlined_call_operand.vmem [shape: f32[1,32], index: 4, kind: input, shape index: {}]   ;;  %s1097_s5 = inlined_call_operand.vmem [shape: f32[1,32], index: 5, kind: input, shape index: {}]   ;;  %s1098_s6 = inlined_call_operand.<no memory space> [shape: f32[1,1], index: 6, kind: input, shape index: {}]   ;;  %s1099_s7 = inlined_call_operand.hbm [shape: f32[2,1,128], index: 7, kind: output, shape index: {}]  }
   0x1   :  { %v12_v0 = vstv %s1098_s6 }
   0x2   :  { %13 = vst [vmem:[#allocation2] sm:$0x1] %v12_v0 }
   0x3   :  { %14 = vsyncpa [#allocation4], 0 }
   0x4   :  { %16 = vsyncpa [#allocation4 + $0x1], 0  ;;  %s894_s26 = smov 0   ;;  %s896_s27 = smov 0  }
   0x5   :  { %s898_s28 = smov 0   ;;  %s900_s29 = smov 0  }
   0x6 LB: > { %s915_s6 = sadd.s32 4294967295, %s848_s29   ;;  %s685_s30 = sadd.s32 4294967294, %s848_s29   ;;  %s848_s29 = sphi %s900_s29, %s1105_s29   ;;  %s844_s28 = sphi %s898_s28, %s1104_s28   ;;  %s840_s27 = sphi %s896_s27, %s1103_s27   ;;  %s836_s26 = sphi %s894_s26, %s1102_s26  }
   0x7   : > { %s919_s8 = sadd.s32 1, %s848_s29   ;;  %s181_s9 = sadd.s32 1, %s844_s28 }
   0x8   : > { %s178_s10 = ssub.s32 %s848_s29, %s919_s8  ;;  %p191_p0 = scmp.ne.s32.totalorder %s844_s28, %s840_s27 }
   0x9   : > { %p179_p1 = scmp.eq.s32.totalorder %s178_s10, 0  ;;  %p192_p2 = scmp.eq.s32.totalorder %s915_s6, 1 }
   0xa   : > { %p197_p3 = scmp.ne.s32.totalorder %s840_s27, %s836_s26  ;;  %p198_p4 = scmp.eq.s32.totalorder %s685_s30, 1 }
   0xb   : > { %s930_s11 = scalar_select %p179_p1, %s844_s28, %s181_s9  }
   0xc   : > { %p932_p5 = por %p192_p2, %p191_p0  ;;  %p936_p6 = por %p198_p4, %p197_p3 }
   0xd   : > { %p688_p7 = scmp.ge.s32.totalorder %s848_s29, 1  ;;  %p243_p8 = scmp.lt.s32.totalorder %s848_s29, 3 }
   0xf   : > { %p244_p9 = pnand %p688_p7, %p243_p8 }
  0x10   : > { %s689_s16 = sshll.u32 (!%p244_p9), %s915_s6, 4  ;;  %s272_s15 = sand.u32 (!%p244_p9), 1, %s840_s27  }
  0x11   : > { %247 = sbr.rel (%p244_p9) target bundleno = 612 (0x264), region = 48  ;;  %p275_p10 = scmp.lt.s32.totalorder (!%p244_p9), %s689_s16, 31 }
  0x12   : > { %s626_s18 = scalar_lea.hbm (!%p244_p9), %s1099_s7, %s915_s6  ;;  %s273_s19 = scalar_lea.vmem (!%p244_p9), [#allocation3], %s272_s15 }
  0x13   : > { %s628_s21 = sshll.u32 (!%p244_p9), %s273_s19, 4  ;;  %s630_s22 = sshll.u32 (!%p244_p9), %s626_s18, 4  ;;  %s629_s21 = int_to_ptr.vmem [resolvable:$true] %s628_s21  ;;  %s631_s22 = int_to_ptr.hbm [resolvable:$true] %s630_s22 }
  0x14   : > { %s618_s23 = scalar_lea.sflag (!%p244_p9), [#allocation4], %s272_s15  ;;  %s800_s24 = sshra.s32 (!%p244_p9), %s631_s22, 4  ;;  %s801_s24 = int_to_ptr.hbm [resolvable:$true] %s800_s24 }
  0x15   : > { %s802_s25 = scalar_lea.hbm (!%p244_p9), %s801_s24, 1  ;;  %s806_s6 = scalar_lea.hbm (!%p244_p9), %s1099_s7, 2 }
  0x16   : > { %v296_v1 = vld [vmem:[%s1093_s1] sm:$0xf]  ;;  %vm350_vm0 = vcmask 1043456   ;;  %s1107_s16 = smov (!%p275_p10, %s689_s16), 31  ;;  %vm301_vm1 = vcmask 31744   ;;  %v450_v11 = vld [vmem:[%s1095_s3 + $0x78] sm:$0xff]  ;;  %p803_p11 = scmp.ne.s32.totalorder %s801_s24, %s802_s25 }
  0x17   : > { %691 = vmatpush.msk.msra.mxu0 %vm350_vm0, %v296_v1  ;;  %s690_s17 = sshll.u32 %s1107_s16, 3  ;;  %v449_v12 = vld [vmem:[%s1095_s3 + $0x70] sm:$0xff]  ;;  %455 = vmatpush.msra.mxu1 %v450_v11  ;;  %v448_v13 = vld [vmem:[%s1095_s3 + $0x68] sm:$0xff]  ;;  %v447_v15 = vld [vmem:[%s1095_s3 + $0x60] sm:$0xff]  ;;  %vm544_vm2 = vcmask 261120   ;;  %p807_p0 = scmp.lt.s32.totalorder %s801_s24, %s1099_s7 }
  0x18   : > { %s949_s20 = scalar_lea.vmem %s1092_s0, %s690_s17  ;;  %727 = vmatpush.msra.mxu3 %v450_v11  ;;  %v446_v16 = vld [vmem:[%s1095_s3 + $0x58] sm:$0xff]  ;;  %v445_v17 = vld [vmem:[%s1095_s3 + $0x50] sm:$0xff]  ;;  %v444_v18 = vld [vmem:[%s1095_s3 + $0x48] sm:$0xff]  ;;  %p804_p12 = pnand %p803_p11, %p932_p5 }
  0x19   : > { %v280_v2 = vld [vmem:[%s949_s20] sm:$0xff]  ;;  %v281_v3 = vld [vmem:[%s949_s20 + $0x8] sm:$0xff]  ;;  %v282_v4 = vld [vmem:[%s949_s20 + $0x10] sm:$0xff]  ;;  %456 = vmatpush.msra.mxu1 %v449_v12  ;;  %p808_p1 = scmp.lt.s32.totalorder %s806_s6, %s802_s25 }
  0x1a   : > { %692 = vmatmul.msk.f32.vlgmr.msra.gmra.mxu0 %vm301_vm1, %v280_v2  ;;  %v283_v5 = vld [vmem:[%s949_s20 + $0x18] sm:$0xff]  ;;  %v284_v6 = vld [vmem:[%s949_s20 + $0x20] sm:$0xff]  ;;  %v285_v7 = vld [vmem:[%s949_s20 + $0x28] sm:$0xff]  ;;  %728 = vmatpush.msra.mxu3 %v449_v12  ;;  %p805_p13 = pneg %p804_p12 }
  0x1b   : > { %v286_v8 = vld [vmem:[%s949_s20 + $0x30] sm:$0xff]  ;;  %v287_v9 = vld [vmem:[%s949_s20 + $0x38] sm:$0xff]  ;;  %v288_v10 = vld [vmem:[%s949_s20 + $0x40] sm:$0xff]  ;;  %457 = vmatpush.msra.mxu1 %v448_v13  ;;  %p809_p2 = por %p808_p1, %p807_p0 }
  0x1c   : > { %v289_v14 = vld [vmem:[%s949_s20 + $0x48] sm:$0xff]  ;;  %729 = vmatpush.msra.mxu3 %v448_v13  ;;  %v290_v19 = vld [vmem:[%s949_s20 + $0x50] sm:$0xff]  ;;  %v443_v20 = vld [vmem:[%s1095_s3 + $0x40] sm:$0xff] }
  0x1d   : > { %458 = vmatpush.msra.mxu1 %v447_v15  ;;  %v442_v21 = vld [vmem:[%s1095_s3 + $0x38] sm:$0xff]  ;;  %v441_v22 = vld [vmem:[%s1095_s3 + $0x30] sm:$0xff]  ;;  %v440_v23 = vld [vmem:[%s1095_s3 + $0x28] sm:$0xff]  ;;  %p810_p3 = pnand %p809_p2, %p805_p13 }
  0x1e   : > { %730 = vmatpush.msra.mxu3 %v447_v15  ;;  %v291_v24 = vld [vmem:[%s949_s20 + $0x58] sm:$0xff]  ;;  %v439_v25 = vld [vmem:[%s1095_s3 + $0x20] sm:$0xff]  ;;  %v437_v27 = vld [vmem:[%s1095_s3 + $0x10] sm:$0xff] }
  0x1f   : > { %459 = vmatpush.msra.mxu1 %v446_v16  ;;  %v438_v26 = vld [vmem:[%s1095_s3 + $0x18] sm:$0xff]  ;;  %v292_v28 = vld [vmem:[%s949_s20 + $0x60] sm:$0xff]  ;;  %v436_v29 = vld [vmem:[%s1095_s3 + $0x8] sm:$0xff] }
  0x20   : > { %731 = vmatpush.msra.mxu3 %v446_v16  ;;  %v435_v30 = vld [vmem:[%s1095_s3] sm:$0xff]  ;;  %v293_v31 = vld [vmem:[%s949_s20 + $0x68] sm:$0xff]  ;;  %v294_v32 = vld [vmem:[%s949_s20 + $0x70] sm:$0xff] }
  0x21   : > { %460 = vmatpush.msra.mxu1 %v445_v17  ;;  %v295_v33 = vld [vmem:[%s949_s20 + $0x78] sm:$0xff]  ;;  %v784_v34 = vld [vmem:[%s1094_s2] ss:$0 sm:$0xff] }
  0x22   : > { %693 = vmatmul.msk.f32.gmra.mxu0 %vm301_vm1, %v281_v3  ;;  %732 = vmatpush.msra.mxu3 %v445_v17 }
  0x23   : > { %461 = vmatpush.msra.mxu1 %v444_v18 }
  0x24   : > { %733 = vmatpush.msra.mxu3 %v444_v18 }
  0x25   : > { %462 = vmatpush.msra.mxu1 %v443_v20 }
  0x26   : > { %734 = vmatpush.msra.mxu3 %v443_v20 }
  0x27   : > { %463 = vmatpush.msra.mxu1 %v442_v21 }
  0x28   : > { %735 = vmatpush.msra.mxu3 %v442_v21 }
  0x29   : > { %464 = vmatpush.msra.mxu1 %v441_v22 }
  0x2a   : > { %694 = vmatmul.msk.f32.gmra.mxu0 %vm301_vm1, %v282_v4  ;;  %736 = vmatpush.msra.mxu3 %v441_v22 }
  0x2b   : > { %465 = vmatpush.msra.mxu1 %v440_v23 }
  0x2c   : > { %737 = vmatpush.msra.mxu3 %v440_v23 }
  0x2d   : > { %466 = vmatpush.msra.mxu1 %v439_v25 }
  0x2e   : > { %738 = vmatpush.msra.mxu3 %v439_v25 }
  0x2f   : > { %467 = vmatpush.msra.mxu1 %v438_v26 }
  0x30   : > { %739 = vmatpush.msra.mxu3 %v438_v26 }
  0x31   : > { %468 = vmatpush.msra.mxu1 %v437_v27 }
  0x32   : > { %695 = vmatmul.msk.f32.gmra.mxu0 %vm301_vm1, %v283_v5  ;;  %740 = vmatpush.msra.mxu3 %v437_v27 }
  0x33   : > { %469 = vmatpush.msra.mxu1 %v436_v29 }
  0x34   : > { %741 = vmatpush.msra.mxu3 %v436_v29 }
  0x35   : > { %470 = vmatpush.msra.mxu1 %v435_v30 }
  0x36   : > { %742 = vmatpush.msra.mxu3 %v435_v30 }
  0x3a   : > { %696 = vmatmul.msk.f32.gmra.mxu0 %vm301_vm1, %v284_v6 }
  0x42   : > { %697 = vmatmul.msk.f32.gmra.mxu0 %vm301_vm1, %v285_v7 }
  0x4a   : > { %698 = vmatmul.msk.f32.gmra.mxu0 %vm301_vm1, %v286_v8 }
  0x52   : > { %699 = vmatmul.msk.f32.gmra.mxu0 %vm301_vm1, %v287_v9 }
  0x5a   : > { %700 = vmatmul.msk.f32.gmra.mxu0 %vm301_vm1, %v288_v10 }
  0x62   : > { %701 = vmatmul.msk.f32.gmra.mxu0 %vm301_vm1, %v289_v14 }
  0x6a   : > { %702 = vmatmul.msk.f32.gmra.mxu0 %vm301_vm1, %v290_v19 }
  0x72   : > { %703 = vmatmul.msk.f32.gmra.mxu0 %vm301_vm1, %v291_v24 }
  0x7a   : > { %704 = vmatmul.msk.f32.gmra.mxu0 %vm301_vm1, %v292_v28 }
  0x82   : > { %705 = vmatmul.msk.f32.gmra.mxu0 %vm301_vm1, %v293_v31  ;;  %v785_v31 = vld [vmem:[%s1096_s4] ss:$0 sm:$0xff] }
  0x8a   : > { %706 = vmatmul.msk.f32.gmra.mxu0 %vm301_vm1, %v294_v32 }
  0x92   : > { %707 = vmatmul.msk.f32.gmra.mxu0 %vm301_vm1, %v295_v33 }
  0x97   : > { %v371_v35 = vpop.f32.mrf.mxu0 }
  0x98   : > { %v372_v36 = vadd.f32 %v784_v34, %v371_v35 }
  0x9a   : > { %v419_v37 = vmax.f32 %v372_v36, 0.0 }
  0x9c   : > { %471 = vmatmul.f32.vlgmr.msra.gmra.mxu1 %v419_v37 }
  0x9f   : > { %v374_v38 = vpop.f32.mrf.mxu0 }
  0xa0   : > { %v375_v39 = vadd.f32 %v784_v34, %v374_v38 }
  0xa2   : > { %v420_v40 = vmax.f32 %v375_v39, 0.0 }
  0xa4   : > { %474 = vmatmul.f32.gmra.mxu1 %v420_v40 }
  0xa7   : > { %v377_v41 = vpop.f32.mrf.mxu0 }
  0xa8   : > { %v378_v42 = vadd.f32 %v784_v34, %v377_v41 }
  0xaa   : > { %v421_v43 = vmax.f32 %v378_v42, 0.0 }
  0xac   : > { %477 = vmatmul.f32.gmra.mxu1 %v421_v43 }
  0xaf   : > { %v380_v44 = vpop.f32.mrf.mxu0 }
  0xb0   : > { %v381_v45 = vadd.f32 %v784_v34, %v380_v44 }
  0xb2   : > { %v422_v46 = vmax.f32 %v381_v45, 0.0 }
  0xb4   : > { %480 = vmatmul.f32.gmra.mxu1 %v422_v46 }
  0xb7   : > { %v383_v47 = vpop.f32.mrf.mxu0 }
  0xb8   : > { %v384_v48 = vadd.f32 %v784_v34, %v383_v47 }
  0xba   : > { %v423_v49 = vmax.f32 %v384_v48, 0.0 }
  0xbc   : > { %483 = vmatmul.f32.gmra.mxu1 %v423_v49 }
  0xbf   : > { %v386_v50 = vpop.f32.mrf.mxu0 }
  0xc0   : > { %v387_v51 = vadd.f32 %v784_v34, %v386_v50 }
  0xc2   : > { %v424_v52 = vmax.f32 %v387_v51, 0.0 }
  0xc4   : > { %486 = vmatmul.f32.gmra.mxu1 %v424_v52 }
  0xc7   : > { %v389_v53 = vpop.f32.mrf.mxu0 }
  0xc8   : > { %v390_v54 = vadd.f32 %v784_v34, %v389_v53 }
  0xca   : > { %v425_v55 = vmax.f32 %v390_v54, 0.0 }
  0xcc   : > { %489 = vmatmul.f32.gmra.mxu1 %v425_v55  ;;  %v537_v55 = vld [vmem:[#allocation2] sm:$0x1] }
  0xcf   : > { %v392_v56 = vpop.f32.mrf.mxu0 }
  0xd0   : > { %v393_v57 = vadd.f32 %v784_v34, %v392_v56  ;;  %v850_v56 = vmov 0  }
  0xd1   : > { %783 = vset.pattern.permute.xlu0 %v850_v56 }
  0xd2   : > { %v426_v58 = vmax.f32 %v393_v57, 0.0  ;;  %540 = vperm.xlu0 %783, %v537_v55  }
  0xd4   : > { %492 = vmatmul.f32.gmra.mxu1 %v426_v58 }
  0xd7   : > { %v395_v59 = vpop.f32.mrf.mxu0 }
  0xd8   : > { %v396_v60 = vadd.f32 %v784_v34, %v395_v59 }
  0xda   : > { %v427_v61 = vmax.f32 %v396_v60, 0.0 }
  0xdc   : > { %495 = vmatmul.f32.gmra.mxu1 %v427_v61 }
  0xdf   : > { %v398_v62 = vpop.f32.mrf.mxu0 }
  0xe0   : > { %v399_v63 = vadd.f32 %v784_v34, %v398_v62 }
  0xe2   : > { %v428_v0 = vmax.f32 %v399_v63, 0.0 }
  0xe4   : > { %498 = vmatmul.f32.vlgmr.msra.gmra.mxu3 %v428_v0 }
  0xe7   : > { %v401_v1 = vpop.f32.mrf.mxu0 }
  0xe8   : > { %v402_v2 = vadd.f32 %v784_v34, %v401_v1 }
  0xea   : > { %v429_v3 = vmax.f32 %v402_v2, 0.0 }
  0xec   : > { %501 = vmatmul.f32.gmra.mxu3 %v429_v3 }
  0xef   : > { %v404_v4 = vpop.f32.mrf.mxu0 }
  0xf0   : > { %v405_v5 = vadd.f32 %v784_v34, %v404_v4 }
  0xf2   : > { %v430_v6 = vmax.f32 %v405_v5, 0.0 }
  0xf4   : > { %504 = vmatmul.f32.gmra.mxu3 %v430_v6  ;;  %v536_v6 = vld [vmem:[%s1097_s5] sm:$0x1] }
  0xf7   : > { %v407_v7 = vpop.f32.mrf.mxu0 }
  0xf8   : > { %v408_v8 = vadd.f32 %v784_v34, %v407_v7 }
  0xfa   : > { %v431_v9 = vmax.f32 %v408_v8, 0.0 }
  0xfc   : > { %507 = vmatmul.f32.gmra.mxu3 %v431_v9 }
  0xff   : > { %v410_v10 = vpop.f32.mrf.mxu0 }
 0x100   : > { %v411_v11 = vadd.f32 %v784_v34, %v410_v10 }
 0x102   : > { %v432_v12 = vmax.f32 %v411_v11, 0.0 }
 0x104   : > { %510 = vmatmul.f32.gmra.mxu3 %v432_v12 }
 0x107   : > { %v413_v13 = vpop.f32.mrf.mxu0 }
 0x108   : > { %v414_v14 = vadd.f32 %v784_v34, %v413_v13 }
 0x10a   : > { %v433_v15 = vmax.f32 %v414_v14, 0.0 }
 0x10c   : > { %513 = vmatmul.f32.gmra.mxu3 %v433_v15 }
 0x10f   : > { %v416_v16 = vpop.f32.mrf.mxu0 }
 0x110   : > { %v417_v17 = vadd.f32 %v784_v34, %v416_v16 }
 0x112   : > { %v434_v18 = vmax.f32 %v417_v17, 0.0 }
 0x114   : > { %516 = vmatmul.f32.gmra.mxu3 %v434_v18 }
 0x119   : > { %v1034_v19 = vpop.f32.mrf.mxu1 }
 0x11a   : > { %v473_v3 = vadd.f32 %v785_v31, %v1034_v19 }
 0x11c   : > { %v520_v5 = vmax.f32 %v473_v3, 0.0 }
 0x121   : > { %v475_v21 = vpop.f32.mrf.mxu1 }
 0x122   : > { %v476_v1 = vadd.f32 %v785_v31, %v475_v21 }
 0x124   : > { %v521_v4 = vmax.f32 %v476_v1, 0.0 }
 0x129   : > { %v478_v23 = vpop.f32.mrf.mxu1 }
 0x12a   : > { %v479_v63 = vadd.f32 %v785_v31, %v478_v23 }
 0x12c   : > { %v522_v2 = vmax.f32 %v479_v63, 0.0 }
 0x131   : > { %v481_v25 = vpop.f32.mrf.mxu1 }
 0x132   : > { %v482_v61 = vadd.f32 %v785_v31, %v481_v25 }
 0x134   : > { %v523_v0 = vmax.f32 %v482_v61, 0.0 }
 0x139   : > { %v484_v27 = vpop.f32.mrf.mxu1 }
 0x13a   : > { %v485_v59 = vadd.f32 %v785_v31, %v484_v27 }
 0x13c   : > { %v524_v62 = vmax.f32 %v485_v59, 0.0 }
 0x141   : > { %v487_v30 = vpop.f32.mrf.mxu1 }
 0x142   : > { %v488_v57 = vadd.f32 %v785_v31, %v487_v30 }
 0x144   : > { %v525_v60 = vmax.f32 %v488_v57, 0.0  ;;  %v541_v7 = vpop.permute.xlu0 %540 }
 0x145   : > { %v543_v8 = vperm.slane %v541_v7, 0 }
 0x149   : > { %v490_v36 = vpop.f32.mrf.mxu1 }
 0x14a   : > { %v491_v53 = vadd.f32 %v785_v31, %v490_v36 }
 0x14c   : > { %v526_v58 = vmax.f32 %v491_v53, 0.0 }
 0x151   : > { %v493_v41 = vpop.f32.mrf.mxu1 }
 0x152   : > { %v494_v51 = vadd.f32 %v785_v31, %v493_v41 }
 0x154   : > { %v527_v54 = vmax.f32 %v494_v51, 0.0 }
 0x159   : > { %v496_v48 = vpop.f32.mrf.mxu1 }
 0x15a   : > { %v497_v49 = vadd.f32 %v785_v31, %v496_v48 }
 0x15c   : > { %v528_v52 = vmax.f32 %v497_v49, 0.0 }
 0x167   : > { %v499_v20 = vpop.f32.mrf.mxu3 }
 0x168   : > { %v500_v46 = vadd.f32 %v785_v31, %v499_v20 }
 0x16a   : > { %v529_v50 = vmax.f32 %v500_v46, 0.0 }
 0x16f   : > { %v502_v22 = vpop.f32.mrf.mxu3 }
 0x170   : > { %v503_v44 = vadd.f32 %v785_v31, %v502_v22 }
 0x172   : > { %v530_v47 = vmax.f32 %v503_v44, 0.0 }
 0x177   : > { %v505_v24 = vpop.f32.mrf.mxu3 }
 0x178   : > { %v506_v42 = vadd.f32 %v785_v31, %v505_v24 }
 0x17a   : > { %v531_v45 = vmax.f32 %v506_v42, 0.0 }
 0x17f   : > { %v508_v26 = vpop.f32.mrf.mxu3 }
 0x180   : > { %v509_v39 = vadd.f32 %v785_v31, %v508_v26 }
 0x182   : > { %v532_v43 = vmax.f32 %v509_v39, 0.0 }
 0x187   : > { %v511_v28 = vpop.f32.mrf.mxu3 }
 0x188   : > { %v512_v37 = vadd.f32 %v785_v31, %v511_v28 }
 0x18a   : > { %v533_v40 = vmax.f32 %v512_v37, 0.0 }
 0x18f   : > { %v514_v29 = vpop.f32.mrf.mxu3 }
 0x190   : > { %v515_v34 = vadd.f32 %v785_v31, %v514_v29 }
 0x192   : > { %v534_v38 = vmax.f32 %v515_v34, 0.0 }
 0x197   : > { %v517_v32 = vpop.f32.mrf.mxu3 }
 0x198   : > { %v518_v33 = vadd.f32 %v785_v31, %v517_v32 }
 0x19a   : > { %v535_v35 = vmax.f32 %v518_v33, 0.0 }
 0x19c   : > { %708 = vmatpush.xpose.msk.msra.mxu2 %vm544_vm2, %v535_v35 }
 0x1a0   : > { %709 = vmatpush.xpose.msk.msra.mxu2 %vm544_vm2, %v534_v38 }
 0x1a4   : > { %710 = vmatpush.xpose.msk.msra.mxu2 %vm544_vm2, %v533_v40 }
 0x1a8   : > { %711 = vmatpush.xpose.msk.msra.mxu2 %vm544_vm2, %v532_v43 }
 0x1ac   : > { %712 = vmatpush.xpose.msk.msra.mxu2 %vm544_vm2, %v531_v45 }
 0x1b0   : > { %713 = vmatpush.xpose.msk.msra.mxu2 %vm544_vm2, %v530_v47 }
 0x1b4   : > { %714 = vmatpush.xpose.msk.msra.mxu2 %vm544_vm2, %v529_v50 }
 0x1b8   : > { %715 = vmatpush.xpose.msk.msra.mxu2 %vm544_vm2, %v528_v52 }
 0x1bc   : > { %716 = vmatpush.xpose.msk.msra.mxu2 %vm544_vm2, %v527_v54 }
 0x1c0   : > { %717 = vmatpush.xpose.msk.msra.mxu2 %vm544_vm2, %v526_v58 }
 0x1c4   : > { %718 = vmatpush.xpose.msk.msra.mxu2 %vm544_vm2, %v525_v60 }
 0x1c8   : > { %719 = vmatpush.xpose.msk.msra.mxu2 %vm544_vm2, %v524_v62 }
 0x1cc   : > { %720 = vmatpush.xpose.msk.msra.mxu2 %vm544_vm2, %v523_v0 }
 0x1d0   : > { %721 = vmatpush.xpose.msk.msra.mxu2 %vm544_vm2, %v522_v2 }
 0x1d4   : > { %722 = vmatpush.xpose.msk.msra.mxu2 %vm544_vm2, %v521_v4 }
 0x1d8   : > { %723 = vmatpush.xpose.msk.msra.mxu2 %vm544_vm2, %v520_v5 }
 0x1db   : > { %724 = vmatmul.msk.f32.vlgmr.msra.gmra.mxu2 %vm544_vm2, %v536_v6 }
 0x25e   : > { %v613_v9 = vpop.f32.mrf.mxu2 }
 0x25f   : > { %v614_v10 = vadd.f32 %v613_v9, %v543_v8 }
 0x261   : > { %616 = vst [vmem:[%s273_s19] sm:$0x1] %v614_v10 }
 0x262   : > { %813 = shalt.err (!%p810_p3)
}
 0x263   : > { %743 = dma.vmem_to_hbm [thread:$0]  (%p932_p5), %s629_s21, 16, %s631_s22, %s618_s23  }
 0x264 PF: > { %p749_p4 = scmp.ge.s32.totalorder %s848_s29, 2  ;;  %s642_s14 = sand.u32 1, %s836_s26  }
 0x265   : > { %s643_s15 = scalar_lea.sflag [#allocation4], %s642_s14 }
 0x266   : > { %p746_p7 = pnand %p749_p4, %p936_p6 }
 0x268   : > { %p747_p8 = pneg %p746_p7 }
 0x26a   : > { %831 = dma.done.wait (%p747_p8), %s643_s15, 16  }
 0x26b   : > { %833 = vsyncadd (%p747_p8), %s643_s15, 4294967280  ;;  %p19_p9 = scmp.ge.s32.totalorder %s919_s8, 4   ;;  %s1102_s26 = smov %s840_s27 }
 0x26c   : > { %s1103_s27 = smov %s844_s28  ;;  %s1104_s28 = smov %s930_s11 }
 0x26d   : > { %s1105_s29 = smov %s919_s8  ;;  %21 = sbr.rel (!%p19_p9) target bundleno = 6 (0x6), region = 83 }
 0x272   :  { %648 = vsyncpa [#allocation4], 1 }
 0x273   :  { %650 = vsyncpa [#allocation4 + $0x1], 1 }

</bundles_post_ra>
